<compile_context>
chip_gen: v7x
topology: tpu7x:2x2x1
jax: 0.10.0
libtpu: 0.0.40
codegen_flags: <defaults>
</compile_context>

<pallas_src>
import functools

import jax
import jax.numpy as jnp
from jax import lax
from jax.experimental import pallas as pl
from jax.experimental.pallas import tpu as pltpu

_LANE = 128      # lane width: output last dim is kept a multiple of this
_SUBLANE = 8     # f32 sublane count: batch blocks are multiples of this


def _round_up(x, m):
    return (x + m - 1) // m * m


def _num_tensorcores():
    """Best-effort TensorCore count (v7x has 2 per chip)."""
    try:
        info = pltpu.get_tpu_info()
    except Exception:
        return 1
    for attr in ("num_cores", "core_count", "num_tensorcores", "tensorcore_count"):
        v = getattr(info, attr, None)
        if isinstance(v, int) and v > 0:
            return v
    return 1


def _choose_block_b(batch, max_block_b):
    """Balanced batch blocks; padding never exceeds 7 rows (masked last block)."""
    min_blocks = 1
    if batch >= 1024:
        # v7x: >=2 parallel grid steps so both TensorCores get work; on
        # single-TC chips the one extra ~0.35us step is noise at this size.
        min_blocks = max(2, _num_tensorcores())
    n_blocks = max(pl.cdiv(batch, max_block_b), min_blocks)
    return _round_up(pl.cdiv(batch, n_blocks), _SUBLANE)


def _resident_spec(block_shape, index_map):
    # Constant-index-map operands are never re-fetched; single-buffer them so
    # the extra copy of the weight is not allocated in VMEM.
    try:
        return pl.BlockSpec(block_shape, index_map, pipeline_mode=pl.Buffered(1))
    except (TypeError, AttributeError):   # older jax without pipeline_mode
        return pl.BlockSpec(block_shape, index_map)


def prepare_linear_params(weight, bias, compute_dtype=None):
    """One-time (init-time) parameter prep for the dense feature projection.

    weight: (N, K) torch nn.Linear layout (out_features, in_features)
    bias:   (N,)
    Returns (weight_t, bias_row, n_out): weight transposed to (K, Np) and
    padded so the kernel output is lane-dense (Np % 128 == 0).  Doing this
    here keeps the per-call path free of jnp.pad HBM copies.
    """
    n_out, _ = weight.shape
    n_pad = _round_up(n_out, _LANE)
    w_t = weight.T                                   # (K, N)
    b = bias
    if n_pad != n_out:
        w_t = jnp.pad(w_t, ((0, 0), (0, n_pad - n_out)))
        b = jnp.pad(b, (0, n_pad - n_out))
    if compute_dtype is not None:
        w_t = w_t.astype(compute_dtype)              # e.g. bf16 MXU operands
    return w_t, b.reshape(1, n_pad), n_out


def _linear_kernel(x_ref, w_ref, b_ref, o_ref, *, precision):
    # x_ref: (TB, K)  w_ref: (K, Np)  b_ref: (1, Np)  o_ref: (TB, Np)
    acc = jnp.dot(x_ref[...], w_ref[...],
                  preferred_element_type=jnp.float32, precision=precision)
    o_ref[...] = (acc + b_ref[...]).astype(o_ref.dtype)


def _linear_kernel_ktiled(x_ref, w_ref, b_ref, o_ref, acc_ref, *, precision):
    # Reduction over K in the last grid axis; VMEM f32 accumulator.
    k = pl.program_id(1)

    @pl.when(k == 0)
    def _():
        acc_ref[...] = jnp.zeros_like(acc_ref)

    acc_ref[...] += jnp.dot(x_ref[...], w_ref[...],
                            preferred_element_type=jnp.float32,
                            precision=precision)

    @pl.when(k == pl.num_programs(1) - 1)
    def _():
        o_ref[...] = (acc_ref[...] + b_ref[...]).astype(o_ref.dtype)


def featurenet_forward(x, weight_t, bias_row, n_out, *,
                       max_block_b=2048,
                       ktile_weight_bytes=16 * 1024 * 1024,
                       block_k=512):
    """Dense feature-projection forward: logits = x @ weight_t + bias.

    x:        (B, K)
    weight_t: (K, Np) from prepare_linear_params (Np % 128 == 0)
    bias_row: (1, Np)
    n_out:    true (unpadded) output width
    """
    batch, k_in = x.shape
    k_w, n_pad = weight_t.shape
    assert k_in == k_w
    assert n_pad % _LANE == 0 and bias_row.shape == (1, n_pad)

    if x.dtype != weight_t.dtype:
        x = x.astype(weight_t.dtype)   # bf16 path: weight cast once at init

    # Full-precision MXU passes when both operands are f32 (parity with the
    # PyTorch f32 reference); default precision for bf16 operands.
    precision = lax.Precision.HIGHEST if x.dtype == jnp.float32 else None

    block_b = _choose_block_b(batch, max_block_b)
    grid_b = pl.cdiv(batch, block_b)      # partial last block masked, not padded
    out_shape = jax.ShapeDtypeStruct((batch, n_pad), x.dtype)

    cost = pl.CostEstimate(
        flops=2 * batch * k_in * n_pad,
        transcendentals=0,
        bytes_accessed=x.dtype.itemsize * (batch * k_in + k_in * n_pad
                                           + batch * n_pad),
    )

    weight_bytes = k_in * n_pad * weight_t.dtype.itemsize
    ktiled = weight_bytes > ktile_weight_bytes and k_in % block_k == 0

    if not ktiled:
        # Weight + bias fully VMEM-resident; one (or a few) big batch blocks.
        out_p = pl.pallas_call(
            functools.partial(_linear_kernel, precision=precision),
            out_shape=out_shape,
            grid_spec=pl.GridSpec(
                grid=(grid_b,),
                in_specs=[
                    pl.BlockSpec((block_b, k_in), lambda i: (i, 0)),   # x
                    _resident_spec((k_in, n_pad), lambda i: (0, 0)),   # weight
                    _resident_spec((1, n_pad), lambda i: (0, 0)),      # bias
                ],
                out_specs=pl.BlockSpec((block_b, n_pad), lambda i: (i, 0)),
            ),
            compiler_params=pltpu.CompilerParams(
                dimension_semantics=("parallel",),
            ),
            cost_estimate=cost,
        )(x, weight_t, bias_row)
    else:
        # Scale-up rule (v7x VMEM budget): weight too large to keep resident;
        # K-tiled reduction grid (reduction axis last, "arbitrary").
        grid_k = k_in // block_k
        out_p = pl.pallas_call(
            functools.partial(_linear_kernel_ktiled, precision=precision),
            out_shape=out_shape,
            grid_spec=pltpu.PrefetchScalarGridSpec(
                num_scalar_prefetch=0,
                grid=(grid_b, grid_k),
                in_specs=[
                    pl.BlockSpec((block_b, block_k), lambda i, k: (i, k)),  # x
                    pl.BlockSpec((block_k, n_pad), lambda i, k: (k, 0)),    # W
                    _resident_spec((1, n_pad), lambda i, k: (0, 0)),        # b
                ],
                out_specs=pl.BlockSpec((block_b, n_pad), lambda i, k: (i, 0)),
                scratch_shapes=[pltpu.VMEM((block_b, n_pad), jnp.float32)],
            ),
            compiler_params=pltpu.CompilerParams(
                dimension_semantics=("parallel", "arbitrary"),
            ),
            cost_estimate=cost,
        )(x, weight_t, bias_row)

    return out_p[:, :n_out]


if __name__ == "__main__":
    key = jax.random.PRNGKey(0)
    k_x, k_w, k_b, k_x2, k_w2, k_b2 = jax.random.split(key, 6)

    # --- Test 1: 'MLPNet'/'CNN1D' feature projection, Linear(64 -> 10), B=16.
    B, K, N = 16, 64, 10
    x = jax.random.normal(k_x, (B, K), dtype=jnp.float32)
    bound = 1.0 / jnp.sqrt(jnp.float32(K))
    weight = jax.random.uniform(k_w, (N, K), minval=-bound, maxval=bound,
                                dtype=jnp.float32)        # torch (out, in)
    bias = jax.random.uniform(k_b, (N,), minval=-bound, maxval=bound,
                              dtype=jnp.float32)

    w_t, b_row, n_out = prepare_linear_params(weight, bias)   # init-time, once
    out = featurenet_forward(x, w_t, b_row, n_out)
    out = jax.block_until_ready(out)
    ref = x @ weight.T + bias
    assert out.shape == (B, N)
    assert jnp.allclose(out, ref, atol=1e-5, rtol=1e-5)

    # --- Test 2: exercise the K-tiled scale-up path (threshold forced to 0).
    B2, K2, N2 = 24, 256, 10
    x2 = jax.random.normal(k_x2, (B2, K2), dtype=jnp.float32)
    bound2 = 1.0 / jnp.sqrt(jnp.float32(K2))
    weight2 = jax.random.uniform(k_w2, (N2, K2), minval=-bound2, maxval=bound2,
                                 dtype=jnp.float32)
    bias2 = jax.random.uniform(k_b2, (N2,), minval=-bound2, maxval=bound2,
                               dtype=jnp.float32)
    w_t2, b_row2, n_out2 = prepare_linear_params(weight2, bias2)
    out2 = featurenet_forward(x2, w_t2, b_row2, n_out2,
                              ktile_weight_bytes=0, block_k=128)
    out2 = jax.block_until_ready(out2)
    ref2 = x2 @ weight2.T + bias2
    assert out2.shape == (B2, N2)
    assert jnp.allclose(out2, ref2, atol=1e-4, rtol=1e-4)

    print("KERNEL_OK")
</pallas_src>

<mosaic_0001>
module attributes {stable_mosaic.version = 11 : i64} {
  func.func @_linear_kernel(%arg0: i32, %arg1: memref<16x64xf32, #tpu.memory_space<vmem>>, %arg2: memref<64x128xf32, #tpu.memory_space<vmem>>, %arg3: memref<1x128xf32, #tpu.memory_space<vmem>>, %arg4: memref<16x128xf32, #tpu.memory_space<vmem>>) attributes {dimension_semantics = [#tpu.dimension_semantics<parallel>], iteration_bounds = array<i64: 1>, scalar_prefetch = 0 : i64, scratch_operands = 0 : i64, tpu.core_type = #tpu.core_type<tc>, window_params = [{transform_indices = @transform_0, window_bounds = array<i64: 16, 64>}, {pipeline_mode = #tpu.pipeline_mode<synchronous>, transform_indices = @transform_1, window_bounds = array<i64: 64, 128>}, {pipeline_mode = #tpu.pipeline_mode<synchronous>, transform_indices = @transform_2, window_bounds = array<i64: 1, 128>}, {transform_indices = @transform_3, window_bounds = array<i64: 16, 128>}]} {
    %c0 = arith.constant 0 : index
    %c0_0 = arith.constant 0 : index
    %0 = vector.load %arg1[%c0, %c0_0] : memref<16x64xf32, #tpu.memory_space<vmem>>, vector<16x64xf32>
    %c0_1 = arith.constant 0 : index
    %c0_2 = arith.constant 0 : index
    %1 = vector.load %arg2[%c0_1, %c0_2] : memref<64x128xf32, #tpu.memory_space<vmem>>, vector<64x128xf32>
    %cst = arith.constant dense<0.000000e+00> : vector<16x128xf32>
    %2 = tpu.matmul %0, %1, %cst {dimension_numbers = #tpu.dot_dimension_numbers<[1], [0], [0], [1], [0, 0, 1, 1], [], []>, precision = #tpu.contract_precision<fp32>} : vector<16x64xf32>, vector<64x128xf32>, vector<16x128xf32> -> vector<16x128xf32>
    %c0_3 = arith.constant 0 : index
    %c0_4 = arith.constant 0 : index
    %3 = vector.load %arg3[%c0_3, %c0_4] : memref<1x128xf32, #tpu.memory_space<vmem>>, vector<1x128xf32>
    %4 = vector.broadcast %3 : vector<1x128xf32> to vector<16x128xf32>
    %5 = arith.addf %2, %4 : vector<16x128xf32>
    %c0_5 = arith.constant 0 : index
    %c0_6 = arith.constant 0 : index
    %6 = vector.load %arg4[%c0_5, %c0_6] : memref<16x128xf32, #tpu.memory_space<vmem>>, vector<16x128xf32>
    tpu.vector_store %arg4[%c0_5, %c0_6], %5 {strides = array<i32>} : memref<16x128xf32, #tpu.memory_space<vmem>>, vector<16x128xf32>,
    return
  }
  func.func @transform_0(%arg0: i32) -> (i32, i32) {
    %c0_i32 = arith.constant 0 : i32
    %c0_i32_0 = arith.constant 0 : i32
    return %arg0, %c0_i32 : i32, i32
  }
  func.func @transform_1(%arg0: i32) -> (i32, i32) {
    %c0_i32 = arith.constant 0 : i32
    %c0_i32_0 = arith.constant 0 : i32
    %c0_i32_1 = arith.constant 0 : i32
    return %c0_i32, %c0_i32_0 : i32, i32
  }
  func.func @transform_2(%arg0: i32) -> (i32, i32) {
    %c0_i32 = arith.constant 0 : i32
    %c0_i32_0 = arith.constant 0 : i32
    %c0_i32_1 = arith.constant 0 : i32
    return %c0_i32, %c0_i32_0 : i32, i32
  }
  func.func @transform_3(%arg0: i32) -> (i32, i32) {
    %c0_i32 = arith.constant 0 : i32
    %c0_i32_0 = arith.constant 0 : i32
    return %arg0, %c0_i32 : i32, i32
  }
}

</mosaic_0001>

<bundles_post_ra>
// kernel: tpu_custom_call.1
= control target key start
LH: loop header
LB: loop body
LE: loop exit
PB: predicated region body
PF: predicated region fallthrough
CT: control target
= control target key end

     0   :  { %8 = vsyncpa [#allocation3], 0  ;;  %s1191_s0 = inlined_call_operand.hbm [shape: f32[16,64], index: 0, kind: input, shape index: {}]   ;;  %s1192_s1 = inlined_call_operand.hbm [shape: f32[64,128], index: 1, kind: input, shape index: {}]   ;;  %s1193_s2 = inlined_call_operand.vmem [shape: f32[1,128], index: 2, kind: input, shape index: {}]   ;;  %s1194_s3 = inlined_call_operand.hbm [shape: f32[16,128], index: 3, kind: output, shape index: {}]  }
   0x1   :  { %9 = vsyncpa [#allocation6], 0 }
   0x2   :  { %10 = vsyncpa [#allocation4], 0  ;;  %s1027_s12 = smov [#allocation2]   ;;  %s955_s16 = scalar_lea.hbm %s1191_s0, 256 }
   0x3   :  { %s16_s13 = sshll.u32 %s1027_s12, 4  ;;  %p956_p0 = scmp.ne.s32.totalorder %s1191_s0, %s955_s16  ;;  %s17_s13 = int_to_ptr.vmem [resolvable:$true] %s16_s13 }
   0x4   :  { %p959_p1 = scmp.lt.u32.totalorder %s955_s16, %s1191_s0 }
   0x6   :  { %p961_p2 = pnand %p959_p1, %p956_p0 }
   0x8   :  { %964 = shalt.err (!%p961_p2)
}
   0x9   :  { %s965_s21 = scalar_lea.vmem %s17_s13, 256  ;;  %p970_p4 = scmp.lt.s32.totalorder %s17_s13, %s17_s13 }
   0xa   :  { %p966_p3 = scmp.ne.s32.totalorder %s17_s13, %s965_s21  ;;  %p971_p5 = scmp.lt.s32.totalorder %s965_s21, %s965_s21 }
   0xc   :  { %p972_p6 = por %p971_p5, %p970_p4 }
   0xe   :  { %p973_p7 = pnand %p972_p6, %p966_p3 }
  0x10   :  { %976 = shalt.err (!%p973_p7)
}
  0x11   :  { %s1028_s22 = smov 128   ;;  %s1029_s23 = smov 8  }
  0x12   :  { %22 = dma.hbm_to_vmem [thread:$0]  %s1191_s0, 256, %s17_s13, [#allocation3], %s1028_s22, %s1028_s22, %s1029_s23  }
  0x13   :  { %s1030_s26 = smov [#allocation5]   ;;  %s977_s30 = scalar_lea.hbm %s1192_s1, 1024 }
  0x14   :  { %s28_s27 = sshll.u32 %s1030_s26, 4  ;;  %p978_p8 = scmp.ne.s32.totalorder %s1192_s1, %s977_s30  ;;  %s29_s27 = int_to_ptr.vmem [resolvable:$true] %s28_s27 }
  0x15   :  { %p981_p9 = scmp.lt.u32.totalorder %s977_s30, %s1192_s1 }
  0x17   :  { %p983_p10 = pnand %p981_p9, %p978_p8 }
  0x19   :  { %986 = shalt.err (!%p983_p10)
}
  0x1a   :  { %s987_s8 = scalar_lea.vmem %s29_s27, 1024  ;;  %p992_p12 = scmp.lt.s32.totalorder %s29_s27, %s29_s27 }
  0x1b   :  { %p988_p11 = scmp.ne.s32.totalorder %s29_s27, %s987_s8  ;;  %p993_p13 = scmp.lt.s32.totalorder %s987_s8, %s987_s8 }
  0x1d   :  { %p994_p0 = por %p993_p13, %p992_p12 }
  0x1f   :  { %p995_p1 = pnand %p994_p0, %p988_p11 }
  0x21   :  { %998 = shalt.err (!%p995_p1)
}
  0x22   :  { %34 = dma.hbm_to_vmem [thread:$0]  %s1192_s1, 1024, %s29_s27, [#allocation6], %s1028_s22, %s1028_s22, %s1029_s23  }
  0x23   :  { %1021 = dma.done.wait [#allocation3], 256  }
  0x24   :  { %1022 = vsyncadd [#allocation3], 4294967040 }
  0x25   :  { %1023 = dma.done.wait [#allocation6], 1024  }
  0x26   :  { %1024 = vsyncadd [#allocation6], 4294966272  ;;  %v45_v0 = vld [vmem:[#allocation5] sm:$0xff]  ;;  %v46_v1 = vld [vmem:[#allocation5 + $0x8] sm:$0xff]  ;;  %vm60_vm0 = vcmask 523264   ;;  %s1031_s11 = smov [#allocation7]  }
  0x27   :  { %v47_v2 = vld [vmem:[#allocation5 + $0x10] sm:$0xff]  ;;  %v68_v3 = vand.u32 4294901760, %v45_v0  ;;  %v71_v4 = vand.u32 4294901760, %v46_v1  ;;  %v48_v5 = vld [vmem:[#allocation5 + $0x18] sm:$0xff]  ;;  %v49_v7 = vld [vmem:[#allocation5 + $0x20] sm:$0xff]  ;;  %s654_s12 = sshll.u32 %s1031_s11, 4  ;;  %s655_s12 = int_to_ptr.vmem [resolvable:$true] %s654_s12 }
  0x28   :  { %v74_v6 = vand.u32 4294901760, %v47_v2  ;;  %v50_v8 = vld [vmem:[#allocation5 + $0x28] sm:$0xff]  ;;  %v77_v9 = vand.u32 4294901760, %v48_v5  ;;  %v80_v10 = vand.u32 4294901760, %v49_v7  ;;  %v51_v12 = vld [vmem:[#allocation5 + $0x30] sm:$0xff]  ;;  %v52_v15 = vld [vmem:[#allocation5 + $0x38] sm:$0xff]  ;;  %p1004_p3 = scmp.lt.s32.totalorder %s655_s12, %s655_s12 }
  0x29   :  { %v83_v11 = vand.u32 4294901760, %v50_v8  ;;  %v43_v13 = vld [vmem:[#allocation2] sm:$0xff]  ;;  %v1082_v14 = vpack.c.bf16 %v71_v4, %v68_v3  ;;  %v44_v16 = vld [vmem:[#allocation2 + $0x8] sm:$0xff]  ;;  %v86_v19 = vand.u32 4294901760, %v51_v12  ;;  %v1096_v24 = vsub.f32 %v45_v0, %v68_v3  ;;  %s999_s13 = scalar_lea.vmem %s655_s12, 256 }
  0x2a   :  { %v62_v17 = vsel %vm60_vm0, %v43_v13, 0  ;;  %v1085_v18 = vpack.c.bf16 %v77_v9, %v74_v6  ;;  %v65_v20 = vsel %vm60_vm0, %v44_v16, 0  ;;  %v1098_v25 = vsub.f32 %v46_v1, %v71_v4  ;;  %p1000_p2 = scmp.ne.s32.totalorder %s655_s12, %s999_s13  ;;  %p1005_p4 = scmp.lt.s32.totalorder %s999_s13, %s999_s13 }
  0x2b   :  { %v1088_v21 = vand.u32 4294901760, %v62_v17  ;;  %843 = vmatprep.subr.bf16.mxu1 %v1082_v14  ;;  %891 = vmatprep.subr.bf16.mxu0 %v1082_v14  ;;  %v1092_v22 = vpack.c.bf16 %v83_v11, %v80_v10  ;;  %v1094_v23 = vand.u32 4294901760, %v65_v20  ;;  %v89_v26 = vand.u32 4294901760, %v52_v15 }
  0x2c   :  { %845 = vmatpush3.bf16.msra.mxu1 %v1082_v14  ;;  %893 = vmatpush3.bf16.msra.mxu0 %v1082_v14  ;;  %v1105_v28 = vsub.f32 %v47_v2, %v74_v6  ;;  %v1107_v29 = vsub.f32 %v48_v5, %v77_v9  ;;  %v163_v30 = vand.u32 4294901760, %v1096_v24  ;;  %v170_v31 = vand.u32 4294901760, %v1098_v25  ;;  %p1006_p5 = por %p1005_p4, %p1004_p3 }
  0x2d   :  { %v1103_v27 = vsub.f32 %v62_v17, %v1088_v21  ;;  %847 = vmatprep.subr.bf16.mxu1 %v1085_v18  ;;  %895 = vmatprep.subr.bf16.mxu0 %v1085_v18  ;;  %v1114_v32 = vsub.f32 %v65_v20, %v1094_v23  ;;  %v1116_v33 = vsub.f32 %v49_v7, %v80_v10 }
  0x2e   :  { %v177_v35 = vand.u32 4294901760, %v1105_v28  ;;  %v184_v36 = vand.u32 4294901760, %v1107_v29  ;;  %v164_v37 = vsub.f32 %v1096_v24, %v163_v30  ;;  %v171_v38 = vsub.f32 %v1098_v25, %v170_v31  ;;  %p1007_p6 = pnand %p1006_p5, %p1000_p2 }
  0x2f   :  { %v142_v34 = vand.u32 4294901760, %v1103_v27  ;;  %v152_v39 = vand.u32 4294901760, %v1114_v32  ;;  %v1124_v40 = vsub.f32 %v50_v8, %v83_v11  ;;  %v1133_v44 = vpack.c.bf16 %v89_v26, %v86_v19 }
  0x30   :  { %849 = vmatpush3.bf16.msra.mxu1 %v1085_v18  ;;  %897 = vmatpush3.bf16.msra.mxu0 %v1085_v18  ;;  %v178_v42 = vsub.f32 %v1105_v28, %v177_v35  ;;  %v185_v43 = vsub.f32 %v1107_v29, %v184_v36  ;;  %v165_v45 = vand.u32 4294901760, %v164_v37  ;;  %v172_v46 = vand.u32 4294901760, %v171_v38 }
  0x31   :  { %v143_v41 = vsub.f32 %v1103_v27, %v142_v34  ;;  %851 = vmatprep.subr.bf16.mxu1 %v1092_v22  ;;  %899 = vmatprep.subr.bf16.mxu0 %v1092_v22  ;;  %v191_v47 = vand.u32 4294901760, %v1116_v33  ;;  %v153_v49 = vsub.f32 %v1114_v32, %v152_v39  ;;  %v198_v50 = vand.u32 4294901760, %v1124_v40 }
  0x32   :  { %801 = vmatprep.mubr.f32.mxu0 %v142_v34  ;;  %v1138_v51 = vsub.f32 %v51_v12, %v86_v19  ;;  %v906_v52 = vpack.c.bf16 %v170_v31, %v163_v30  ;;  %v179_v53 = vand.u32 4294901760, %v178_v42  ;;  %v186_v54 = vand.u32 4294901760, %v185_v43 }
  0x33   :  { %v144_v48 = vand.u32 4294901760, %v143_v41  ;;  %v211_v55 = vsub.f32 %v52_v15, %v89_v26  ;;  %v858_v56 = vpack.c.bf16 %v172_v46, %v165_v45  ;;  %v192_v57 = vsub.f32 %v1116_v33, %v191_v47 }
  0x34   :  { %853 = vmatpush3.bf16.msra.mxu1 %v1092_v22  ;;  %901 = vmatpush3.bf16.msra.mxu0 %v1092_v22  ;;  %v199_v58 = vsub.f32 %v1124_v40, %v198_v50  ;;  %v205_v59 = vand.u32 4294901760, %v1138_v51  ;;  %v154_v61 = vand.u32 4294901760, %v153_v49  ;;  %v862_v62 = vpack.c.bf16 %v186_v54, %v179_v53 }
  0x35   :  { %855 = vmatprep.subr.bf16.mxu1 %v1133_v44  ;;  %903 = vmatprep.subr.bf16.mxu0 %v1133_v44  ;;  %v212_v60 = vand.u32 4294901760, %v211_v55  ;;  %v910_v63 = vpack.c.bf16 %v184_v36, %v177_v35  ;;  %v193_v0 = vand.u32 4294901760, %v192_v57  ;;  %v914_v5 = vpack.c.bf16 %v198_v50, %v191_v47 }
  0x36   :  { %744 = vmatprep.mubr.f32.mxu1 %v144_v48  ;;  %v200_v1 = vand.u32 4294901760, %v199_v58  ;;  %v206_v2 = vsub.f32 %v1138_v51, %v205_v59  ;;  %v874_v10 = vpack.c.bf16 %v1098_v25, %v1096_v24  ;;  %v878_v11 = vpack.c.bf16 %v1107_v29, %v1105_v28 }
  0x37   :  { %v213_v3 = vsub.f32 %v211_v55, %v212_v60  ;;  %v918_v9 = vpack.c.bf16 %v212_v60, %v205_v59  ;;  %v882_v12 = vpack.c.bf16 %v1124_v40, %v1116_v33  ;;  %v886_v13 = vpack.c.bf16 %v211_v55, %v1138_v51 }
  0x38   :  { %857 = vmatpush3.bf16.msra.mxu1 %v1133_v44  ;;  %905 = vmatpush3.bf16.msra.mxu0 %v1133_v44  ;;  %v866_v4 = vpack.c.bf16 %v200_v1, %v193_v0  ;;  %v207_v6 = vand.u32 4294901760, %v206_v2 }
  0x39   :  { %859 = vmatprep.subr.bf16.mxu1 %v858_v56  ;;  %907 = vmatprep.subr.bf16.mxu0 %v906_v52  ;;  %v214_v7 = vand.u32 4294901760, %v213_v3 }
  0x3b   :  { %745 = vmatmul.mubr.f32.vlgmr.msra.gmra.mrb[0].mxu1 %v154_v61  ;;  %802 = vmatmul.mubr.f32.vlgmr.msra.gmra.mrb[0].mxu0 %v152_v39  ;;  %v870_v8 = vpack.c.bf16 %v214_v7, %v207_v6 }
  0x3c   :  { %861 = vmatpush3.bf16.msra.mxu1 %v858_v56  ;;  %909 = vmatpush3.bf16.msra.mxu0 %v906_v52 }
  0x3d   :  { %863 = vmatprep.subr.bf16.mxu1 %v862_v62  ;;  %911 = vmatprep.subr.bf16.mxu0 %v910_v63 }
  0x3e   :  { %763 = vmatprep.mubr.f32.mxu1 %v1088_v21  ;;  %820 = vmatprep.mubr.f32.mxu0 %v1088_v21 }
  0x40   :  { %865 = vmatpush3.bf16.msra.mxu1 %v862_v62  ;;  %913 = vmatpush3.bf16.msra.mxu0 %v910_v63 }
  0x41   :  { %867 = vmatprep.subr.bf16.mxu1 %v866_v4  ;;  %915 = vmatprep.subr.bf16.mxu0 %v914_v5 }
  0x44   :  { %869 = vmatpush3.bf16.msra.mxu1 %v866_v4  ;;  %917 = vmatpush3.bf16.msra.mxu0 %v914_v5 }
  0x45   :  { %871 = vmatprep.subr.bf16.mxu1 %v870_v8  ;;  %919 = vmatprep.subr.bf16.mxu0 %v918_v9 }
  0x48   :  { %873 = vmatpush3.bf16.msra.mxu1 %v870_v8  ;;  %921 = vmatpush3.bf16.msra.mxu0 %v918_v9 }
  0x49   :  { %875 = vmatprep.subr.bf16.mxu1 %v874_v10  ;;  %923 = vmatprep.subr.bf16.mxu0 %v1082_v14 }
  0x4b   :  { %764 = vmatmul.mubr.f32.vlgmr.msra.gmra.mrb[0].mxu1 %v1094_v23  ;;  %821 = vmatmul.mubr.f32.vlgmr.msra.gmra.mrb[0].mxu0 %v1094_v23 }
  0x4c   :  { %877 = vmatpush3.bf16.msra.mxu1 %v874_v10  ;;  %925 = vmatpush3.bf16.msra.mxu0 %v1082_v14  ;;  %v667_v14 = vld [vmem:[%s1193_s2] ss:$0 sm:$0xff] }
  0x4d   :  { %879 = vmatprep.subr.bf16.mxu1 %v878_v11  ;;  %927 = vmatprep.subr.bf16.mxu0 %v1085_v18 }
  0x4e   :  { %782 = vmatprep.mubr.f32.mxu1 %v1103_v27  ;;  %839 = vmatprep.mubr.f32.mxu0 %v1088_v21 }
  0x50   :  { %881 = vmatpush3.bf16.msra.mxu1 %v878_v11  ;;  %929 = vmatpush3.bf16.msra.mxu0 %v1085_v18 }
  0x51   :  { %883 = vmatprep.subr.bf16.mxu1 %v882_v12  ;;  %931 = vmatprep.subr.bf16.mxu0 %v1092_v22 }
  0x54   :  { %885 = vmatpush3.bf16.msra.mxu1 %v882_v12  ;;  %933 = vmatpush3.bf16.msra.mxu0 %v1092_v22 }
  0x55   :  { %887 = vmatprep.subr.bf16.mxu1 %v886_v13  ;;  %935 = vmatprep.subr.bf16.mxu0 %v1133_v44 }
  0x58   :  { %889 = vmatpush3.bf16.msra.mxu1 %v886_v13  ;;  %937 = vmatpush3.bf16.msra.mxu0 %v1133_v44 }
  0x5b   :  { %783 = vmatmul.mubr.f32.vlgmr.msra.gmra.mrb[0].mxu1 %v1114_v32  ;;  %840 = vmatmul.mubr.f32.vlgmr.msra.gmra.mrb[0].mxu0 %v1094_v23 }
 0x12e   :  { %v784_v15 = vpop.f32.mrb[0].mxu1  ;;  %v841_v16 = vpop.f32.mrb[0].mxu0 }
 0x12f   :  { %v938_v17 = vadd.f32 %v784_v15, %v667_v14  ;;  %v361_v18 = vpop.f32.mrb[1].mxu1  ;;  %v637_v19 = vpop.f32.mrb[1].mxu0 }
 0x130   :  { %v940_v20 = vadd.f32 %v667_v14, %v361_v18 }
 0x131   :  { %v939_v21 = vadd.f32 %v938_v17, %v841_v16 }
 0x132   :  { %v941_v22 = vadd.f32 %v940_v20, %v637_v19 }
 0x133   :  { %648 = vst [vmem:[#allocation7 + $0x8] sm:$0xff] %v939_v21 }
 0x134   :  { %647 = vst [vmem:[#allocation7] sm:$0xff] %v941_v22 }
 0x135   :  { %1010 = shalt.err (!%p1007_p6)
}
 0x136   :  { %s1011_s15 = scalar_lea.hbm %s1194_s3, 256 }
 0x137   :  { %p1012_p7 = scmp.ne.s32.totalorder %s1194_s3, %s1011_s15  ;;  %p1015_p8 = scmp.lt.u32.totalorder %s1011_s15, %s1194_s3 }
 0x139   :  { %p1017_p9 = pnand %p1015_p8, %p1012_p7 }
 0x13b   :  { %1020 = shalt.err (!%p1017_p9)
}
 0x13c   :  { %660 = dma.vmem_to_hbm [thread:$0]  %s655_s12, 256, %s1194_s3, [#allocation4], %s1028_s22, %s1028_s22, %s1029_s23  }
 0x13d   :  { %1025 = dma.done.wait [#allocation4], 256  }
 0x13e   :  { %1026 = vsyncadd [#allocation4], 4294967040 }
 0x13f   :  { %664 = vsyncpa [#allocation3], 1 }
 0x140   :  { %665 = vsyncpa [#allocation6], 1 }
 0x141   :  { %666 = vsyncpa [#allocation4], 1 }

</bundles_post_ra>
